<compile_context>
chip_gen: v5e
topology: v5e:2x2
jax: 0.10.0
libtpu: 0.0.40
codegen_flags: <defaults>
</compile_context>

<pallas_src>
import numpy as np
import jax
import jax.numpy as jnp
from jax import lax
from jax.experimental import pallas as pl
from jax.experimental.pallas import tpu as pltpu

_LANES = 128
_SUBLANES = 8


def _round_up(x, m):
    return ((x + m - 1) // m) * m


def _make_partial_kernel(tile_rows, rows_valid, need_mask):
    """Builds the per-tile partial-reduction kernel (constants closed over)."""

    def kernel(m1_ref, m2_ref, inter_ref, s12_ref):
        k = pl.program_id(0)

        @pl.when(k == 0)
        def _():
            inter_ref[...] = jnp.zeros_like(inter_ref)
            s12_ref[...] = jnp.zeros_like(s12_ref)

        # (N, tile_rows, 128); upcast so bf16 inputs accumulate in f32.
        m1 = m1_ref[...].astype(jnp.float32)
        m2 = m2_ref[...].astype(jnp.float32)

        if need_mask:
            # Last row-tile is ragged: rows beyond `rows_valid` hold
            # unspecified data (no host-side padding) — zero them out before
            # any arithmetic. All-true on non-last tiles; VPU cost is noise
            # under the DMA.
            row0 = k * tile_rows
            row_idx = lax.broadcasted_iota(jnp.int32, m1.shape, 1) + row0
            valid = row_idx < rows_valid
            zero = jnp.float32(0.0)
            m1 = jnp.where(valid, m1, zero)
            m2 = jnp.where(valid, m2, zero)

        # Lane-resident partial sums: only the sublane (tile_rows) axis is
        # reduced per step; the single cross-lane reduce + the non-linear dice
        # formula run once in the wrapper on a tiny (N,128) array.
        inter_ref[...] += jnp.sum(m1 * m2, axis=1)   # (N, 128)
        s12_ref[...] += jnp.sum(m1 + m2, axis=1)     # merged sum(m1)+sum(m2)

    return kernel


def soft_dice_loss(logits, targets, *, block_budget_bytes=4 * 1024 * 1024,
                   cast_to_bf16=False):
    """logits, targets: (N, C, H, W), any float dtype. Returns scalar f32 loss.

    cast_to_bf16=True halves HBM read traffic (targets are binary so lossless;
    logits lose a few mantissa bits — accumulation stays f32).
    """
    assert logits.shape == targets.shape
    n = logits.shape[0]
    d = int(np.prod(logits.shape[1:]))

    if cast_to_bf16:
        logits = logits.astype(jnp.bfloat16)
        targets = targets.astype(jnp.bfloat16)

    m1 = logits.reshape(n, d)
    m2 = targets.reshape(n, d)
    itemsize1 = jnp.dtype(m1.dtype).itemsize
    itemsize2 = jnp.dtype(m2.dtype).itemsize

    # ---- lane-dense (N, rows, 128) view (free reshape, no data movement) ----
    if d % _LANES != 0:
        # TODO(synk): lane-ragged D (rare for conv feature maps) still takes a
        # small host-side pad (one copy); could be removed with a 2-D blocked
        # layout + per-lane masking.
        d_pad = _round_up(d, _LANES)
        m1 = jnp.pad(m1, ((0, 0), (0, d_pad - d)))
        m2 = jnp.pad(m2, ((0, 0), (0, d_pad - d)))
        d = d_pad
    rows = d // _LANES
    m1 = m1.reshape(n, rows, _LANES)
    m2 = m2.reshape(n, rows, _LANES)

    # ---- per-chip VMEM capacity (64 MiB on v7x, 128 MiB on v5e/v6e) ----
    try:
        vmem_cap = int(pltpu.get_tpu_info().vmem_capacity_bytes)
    except Exception:  # pragma: no cover - conservative fallback (v7x size)
        vmem_cap = 64 * 1024 * 1024

    out_bytes = 2 * n * _LANES * 4  # two f32 (N,128) accumulators

    # Largest lane-dense per-input block within budget, never exceeding ~70% of
    # physical VMEM for the double-buffered working set (2 inputs x 2 buffers).
    per_input_budget = (int(0.7 * vmem_cap) - 2 * out_bytes - (2 << 20)) // 4
    per_input_budget = max(per_input_budget, _SUBLANES * n * _LANES * 4)
    per_input_budget = min(per_input_budget, int(block_budget_bytes))

    itemsize = max(itemsize1, itemsize2)
    max_tile_rows = max(
        _SUBLANES,
        (per_input_budget // (n * _LANES * itemsize)) // _SUBLANES * _SUBLANES,
    )
    tile_rows = min(_round_up(rows, _SUBLANES), max_tile_rows)
    num_tiles = (rows + tile_rows - 1) // tile_rows
    need_mask = (rows % tile_rows) != 0

    # ---- VMEM limit: never below the actual double-buffered working set ----
    block_bytes_both = n * tile_rows * _LANES * (itemsize1 + itemsize2)
    need = 2 * block_bytes_both + 2 * out_bytes + (2 << 20)
    vmem_limit = int(min(max(need, 16 << 20), vmem_cap))

    in_spec = pl.BlockSpec((n, tile_rows, _LANES), lambda k: (0, k, 0))
    out_spec = pl.BlockSpec((n, _LANES), lambda k: (0, 0))  # resident accumulators

    cost = pl.CostEstimate(
        flops=5 * n * rows * _LANES,
        transcendentals=0,
        bytes_accessed=n * rows * _LANES * (itemsize1 + itemsize2) + out_bytes,
    )

    kernel = _make_partial_kernel(tile_rows, rows, need_mask)

    inter_part, s12_part = pl.pallas_call(
        kernel,
        out_shape=(
            jax.ShapeDtypeStruct((n, _LANES), jnp.float32),
            jax.ShapeDtypeStruct((n, _LANES), jnp.float32),
        ),
        grid_spec=pltpu.PrefetchScalarGridSpec(
            num_scalar_prefetch=0,
            grid=(num_tiles,),
            in_specs=[in_spec, in_spec],
            out_specs=[out_spec, out_spec],
        ),
        compiler_params=pltpu.CompilerParams(
            dimension_semantics=("arbitrary",),
            vmem_limit_bytes=vmem_limit,
        ),
        cost_estimate=cost,
    )(m1, m2)

    # ---- tiny finalize on partial sums (non-linear dice formula) ----
    smooth = jnp.float32(1.0)
    inter_b = jnp.sum(inter_part, axis=1)   # (N,)
    s12_b = jnp.sum(s12_part, axis=1)       # (N,) = sum(m1) + sum(m2)
    score = 2.0 * (inter_b + smooth) / (s12_b + smooth)
    return (1.0 - jnp.sum(score) / jnp.float32(n)).astype(jnp.float32)


def _reference(logits, targets):
    smooth = 1.0
    n = logits.shape[0]
    m1 = logits.reshape(n, -1).astype(jnp.float32)
    m2 = targets.reshape(n, -1).astype(jnp.float32)
    inter = jnp.sum(m1 * m2, axis=1)
    score = 2.0 * (inter + smooth) / (jnp.sum(m1, axis=1) + jnp.sum(m2, axis=1) + smooth)
    return 1.0 - jnp.sum(score) / n


if __name__ == "__main__":
    # SoftDiceLoss.__init__ has no parameters -> nothing to initialize.
    key = jax.random.PRNGKey(0)
    k1, k2 = jax.random.split(key)

    N, C, H, W = 2, 4, 16, 16
    logits = jax.random.uniform(k1, (N, C, H, W), dtype=jnp.float32)
    targets = (jax.random.uniform(k2, (N, C, H, W)) > 0.5).astype(jnp.float32)

    ref = _reference(logits, targets)

    # f32 path: matches the PyTorch reference tightly.
    loss = jax.block_until_ready(soft_dice_loss(logits, targets))
    np.testing.assert_allclose(np.asarray(loss), np.asarray(ref), rtol=1e-5, atol=1e-5)

    # bf16-input path (halves HBM traffic; f32 accumulation inside the kernel).
    loss_bf16 = jax.block_until_ready(soft_dice_loss(logits, targets, cast_to_bf16=True))
    np.testing.assert_allclose(np.asarray(loss_bf16), np.asarray(ref), rtol=2e-2, atol=2e-2)

    print("KERNEL_OK")
</pallas_src>

<mosaic_0001>
module attributes {stable_mosaic.version = 11 : i64} {
  func.func @kernel(%arg0: i32, %arg1: memref<2x8x128xf32, #tpu.memory_space<vmem>>, %arg2: memref<2x8x128xf32, #tpu.memory_space<vmem>>, %arg3: memref<2x128xf32, #tpu.memory_space<vmem>>, %arg4: memref<2x128xf32, #tpu.memory_space<vmem>>) attributes {dimension_semantics = [#tpu.dimension_semantics<arbitrary>], iteration_bounds = array<i64: 1>, scalar_prefetch = 0 : i64, scratch_operands = 0 : i64, tpu.core_type = #tpu.core_type<tc>, window_params = [{transform_indices = @transform_0, window_bounds = array<i64: 2, 8, 128>}, {transform_indices = @transform_1, window_bounds = array<i64: 2, 8, 128>}, {pipeline_mode = #tpu.pipeline_mode<synchronous>, transform_indices = @transform_2, window_bounds = array<i64: 2, 128>}, {pipeline_mode = #tpu.pipeline_mode<synchronous>, transform_indices = @transform_3, window_bounds = array<i64: 2, 128>}]} {
    %c0_i32 = arith.constant 0 : i32
    %0 = arith.cmpi eq, %arg0, %c0_i32 : i32
    %1 = arith.extui %0 : i1 to i32
    %c0_i32_0 = arith.constant 0 : i32
    %2 = arith.cmpi ne, %1, %c0_i32_0 : i32
    scf.if %2 {
      %cst_15 = arith.constant 0.000000e+00 : f32
      %15 = vector.broadcast %cst_15 : f32 to vector<2x128xf32>
      %c0_16 = arith.constant 0 : index
      %c0_17 = arith.constant 0 : index
      %16 = vector.load %arg3[%c0_16, %c0_17] : memref<2x128xf32, #tpu.memory_space<vmem>>, vector<2x128xf32>
      tpu.vector_store %arg3[%c0_16, %c0_17], %15 {strides = array<i32>} : memref<2x128xf32, #tpu.memory_space<vmem>>, vector<2x128xf32>,
      %cst_18 = arith.constant 0.000000e+00 : f32
      %17 = vector.broadcast %cst_18 : f32 to vector<2x128xf32>
      %c0_19 = arith.constant 0 : index
      %c0_20 = arith.constant 0 : index
      %18 = vector.load %arg4[%c0_19, %c0_20] : memref<2x128xf32, #tpu.memory_space<vmem>>, vector<2x128xf32>
      tpu.vector_store %arg4[%c0_19, %c0_20], %17 {strides = array<i32>} : memref<2x128xf32, #tpu.memory_space<vmem>>, vector<2x128xf32>,
    } else {
    }
    %c0 = arith.constant 0 : index
    %c0_1 = arith.constant 0 : index
    %c0_2 = arith.constant 0 : index
    %3 = vector.load %arg1[%c0, %c0_1, %c0_2] : memref<2x8x128xf32, #tpu.memory_space<vmem>>, vector<2x8x128xf32>
    %c0_3 = arith.constant 0 : index
    %c0_4 = arith.constant 0 : index
    %c0_5 = arith.constant 0 : index
    %4 = vector.load %arg2[%c0_3, %c0_4, %c0_5] : memref<2x8x128xf32, #tpu.memory_space<vmem>>, vector<2x8x128xf32>
    %c0_6 = arith.constant 0 : index
    %c0_7 = arith.constant 0 : index
    %5 = vector.load %arg3[%c0_6, %c0_7] : memref<2x128xf32, #tpu.memory_space<vmem>>, vector<2x128xf32>
    %6 = arith.mulf %3, %4 : vector<2x8x128xf32>
    %cst = arith.constant dense<0.000000e+00> : vector<2x128xf32>
    %7 = vector.multi_reduction <add>, %6, %cst [1] : vector<2x8x128xf32> to vector<2x128xf32>
    %8 = arith.addf %5, %7 : vector<2x128xf32>
    %c0_8 = arith.constant 0 : index
    %c0_9 = arith.constant 0 : index
    %9 = vector.load %arg3[%c0_8, %c0_9] : memref<2x128xf32, #tpu.memory_space<vmem>>, vector<2x128xf32>
    tpu.vector_store %arg3[%c0_8, %c0_9], %8 {strides = array<i32>} : memref<2x128xf32, #tpu.memory_space<vmem>>, vector<2x128xf32>,
    %c0_10 = arith.constant 0 : index
    %c0_11 = arith.constant 0 : index
    %10 = vector.load %arg4[%c0_10, %c0_11] : memref<2x128xf32, #tpu.memory_space<vmem>>, vector<2x128xf32>
    %11 = arith.addf %3, %4 : vector<2x8x128xf32>
    %cst_12 = arith.constant dense<0.000000e+00> : vector<2x128xf32>
    %12 = vector.multi_reduction <add>, %11, %cst_12 [1] : vector<2x8x128xf32> to vector<2x128xf32>
    %13 = arith.addf %10, %12 : vector<2x128xf32>
    %c0_13 = arith.constant 0 : index
    %c0_14 = arith.constant 0 : index
    %14 = vector.load %arg4[%c0_13, %c0_14] : memref<2x128xf32, #tpu.memory_space<vmem>>, vector<2x128xf32>
    tpu.vector_store %arg4[%c0_13, %c0_14], %13 {strides = array<i32>} : memref<2x128xf32, #tpu.memory_space<vmem>>, vector<2x128xf32>,
    return
  }
  func.func @transform_0(%arg0: i32) -> (i32, i32, i32) {
    %c0_i32 = arith.constant 0 : i32
    %c0_i32_0 = arith.constant 0 : i32
    %c0_i32_1 = arith.constant 0 : i32
    return %c0_i32, %arg0, %c0_i32_0 : i32, i32, i32
  }
  func.func @transform_1(%arg0: i32) -> (i32, i32, i32) {
    %c0_i32 = arith.constant 0 : i32
    %c0_i32_0 = arith.constant 0 : i32
    %c0_i32_1 = arith.constant 0 : i32
    return %c0_i32, %arg0, %c0_i32_0 : i32, i32, i32
  }
  func.func @transform_2(%arg0: i32) -> (i32, i32) {
    %c0_i32 = arith.constant 0 : i32
    %c0_i32_0 = arith.constant 0 : i32
    %c0_i32_1 = arith.constant 0 : i32
    return %c0_i32, %c0_i32_0 : i32, i32
  }
  func.func @transform_3(%arg0: i32) -> (i32, i32) {
    %c0_i32 = arith.constant 0 : i32
    %c0_i32_0 = arith.constant 0 : i32
    %c0_i32_1 = arith.constant 0 : i32
    return %c0_i32, %c0_i32_0 : i32, i32
  }
}

</mosaic_0001>

<bundles_post_ra>
// kernel: tpu_custom_call.1
= control target key start
LH: loop header
LB: loop body
LE: loop exit
PB: predicated region body
PF: predicated region fallthrough
CT: control target
= control target key end

     0   :  { %9 = vsyncpa [#allocation3], 0  ;;  %s284_s0 = inlined_call_operand.hbm [shape: f32[2,8,128], index: 0, kind: input, shape index: {}]   ;;  %s285_s1 = inlined_call_operand.hbm [shape: f32[2,8,128], index: 1, kind: input, shape index: {}]   ;;  %s286_s2 = inlined_call_operand.hbm [shape: f32[2,128], index: 2, kind: output, shape index: {0}]   ;;  %s287_s3 = inlined_call_operand.hbm [shape: f32[2,128], index: 3, kind: output, shape index: {1}]  }
   0x1   :  { %10 = vsyncpa [#allocation6], 0 }
   0x2   :  { %11 = vsyncpa [#allocation4], 0 }
   0x3   :  { %12 = vsyncpa [#allocation9], 0  ;;  %s17_s14 = sshll.u32 %s284_s0, 4  ;;  %s245_s15 = smov [#allocation2]   ;;  %s18_s14 = int_to_ptr.hbm [resolvable:$true] %s17_s14 }
   0x4   :  { %s19_s16 = sshll.u32 %s245_s15, 4  ;;  %s30_s19 = sshll.u32 %s285_s1, 4  ;;  %s20_s16 = int_to_ptr.vmem [resolvable:$true] %s19_s16  ;;  %s31_s19 = int_to_ptr.hbm [resolvable:$true] %s30_s19 }
   0x5   :  { %s246_s20 = smov 128   ;;  %s247_s21 = smov 8  }
   0x6   :  { %25 = dma.hbm_to_vmem [thread:$0]  %s18_s14, 256, %s20_s16, [#allocation3], %s246_s20, %s246_s20, %s247_s21  }
   0x7   :  { %s248_s22 = smov [#allocation5]  }
   0x8   :  { %s32_s23 = sshll.u32 %s248_s22, 4  ;;  %s33_s23 = int_to_ptr.vmem [resolvable:$true] %s32_s23 }
   0x9   :  { %38 = dma.hbm_to_vmem [thread:$0]  %s31_s19, 256, %s33_s23, [#allocation6], %s246_s20, %s246_s20, %s247_s21  }
   0xa   :  { %237 = dma.done.wait [#allocation3], 256  }
   0xb   :  { %238 = vsyncadd [#allocation3], 4294967040 }
   0xc   :  { %239 = dma.done.wait [#allocation6], 256  }
   0xd   :  { %240 = vsyncadd [#allocation6], 4294967040  ;;  %v249_v0 = vmov 0.0   ;;  %v53_v1 = vld [vmem:[#allocation2] sm:$0xff]  ;;  %v54_v2 = vld [vmem:[#allocation2 + $0x8] sm:$0xff]  ;;  %vm74_vm0 = vcmask 1041409  }
   0xe   :  { %51 = vst [vmem:[#allocation7] sm:$0x3] %v249_v0  ;;  %v55_v3 = vld [vmem:[#allocation5] sm:$0xff]  ;;  %v56_v4 = vld [vmem:[#allocation5 + $0x8] sm:$0xff]  ;;  %s250_s0 = smov [#allocation7]   ;;  %s107_s26 = sshll.u32 %s286_s2, 4  ;;  %s108_s26 = int_to_ptr.hbm [resolvable:$true] %s107_s26 }
   0xf   :  { %52 = vst [vmem:[#allocation8] sm:$0x3] %v249_v0  ;;  %v58_v5 = vmul.f32 %v55_v3, %v53_v1  ;;  %v80_v6 = vadd.f32 %v55_v3, %v53_v1  ;;  %v59_v7 = vmul.f32 %v56_v4, %v54_v2  ;;  %v81_v8 = vadd.f32 %v56_v4, %v54_v2  ;;  %s105_s1 = sshll.u32 %s250_s0, 4  ;;  %s251_s27 = smov [#allocation8]   ;;  %s106_s1 = int_to_ptr.vmem [resolvable:$true] %s105_s1 }
  0x10   :  { %s116_s28 = sshll.u32 %s251_s27, 4  ;;  %s118_s4 = sshll.u32 %s287_s3, 4  ;;  %s117_s28 = int_to_ptr.vmem [resolvable:$true] %s116_s28  ;;  %s119_s4 = int_to_ptr.hbm [resolvable:$true] %s118_s4 }
  0x11   :  { %v60_v9 = vrot.slane %v58_v5, 4  ;;  %v82_v10 = vrot.slane %v80_v6, 4  ;;  %v66_v11 = vrot.slane %v59_v7, 4  ;;  %v88_v12 = vrot.slane %v81_v8, 4 }
  0x13   :  { %v61_v13 = vadd.f32 %v60_v9, %v58_v5  ;;  %v83_v14 = vadd.f32 %v82_v10, %v80_v6  ;;  %v67_v15 = vadd.f32 %v66_v11, %v59_v7  ;;  %v89_v16 = vadd.f32 %v88_v12, %v81_v8 }
  0x15   :  { %v62_v17 = vrot.slane %v61_v13, 2  ;;  %v84_v18 = vrot.slane %v83_v14, 2  ;;  %v68_v19 = vrot.slane %v67_v15, 2  ;;  %v90_v20 = vrot.slane %v89_v16, 2  ;;  %v57_v31 = vld [vmem:[#allocation7] sm:$0x3] }
  0x16   :  { %v79_v33 = vld [vmem:[#allocation8] sm:$0x3] }
  0x17   :  { %v63_v21 = vadd.f32 %v62_v17, %v61_v13  ;;  %v85_v22 = vadd.f32 %v84_v18, %v83_v14  ;;  %v69_v23 = vadd.f32 %v68_v19, %v67_v15  ;;  %v91_v24 = vadd.f32 %v90_v20, %v89_v16 }
  0x19   :  { %v64_v25 = vrot.slane %v63_v21, 1  ;;  %v86_v26 = vrot.slane %v85_v22, 1  ;;  %v70_v27 = vrot.slane %v69_v23, 1  ;;  %v92_v28 = vrot.slane %v91_v24, 1 }
  0x1b   :  { %v65_v29 = vadd.f32 %v64_v25, %v63_v21  ;;  %v87_v30 = vadd.f32 %v86_v26, %v85_v22  ;;  %v71_v32 = vadd.f32 %v70_v27, %v69_v23  ;;  %v93_v34 = vadd.f32 %v92_v28, %v91_v24 }
  0x1d   :  { %v75_v35 = vsel %vm74_vm0, %v71_v32, %v65_v29  ;;  %v96_v36 = vsel %vm74_vm0, %v93_v34, %v87_v30 }
  0x1e   :  { %v77_v37 = vadd.f32 %v75_v35, %v57_v31  ;;  %v98_v38 = vadd.f32 %v96_v36, %v79_v33 }
  0x20   :  { %78 = vst [vmem:[#allocation7] sm:$0x3] %v77_v37 }
  0x21   :  { %99 = vst [vmem:[#allocation8] sm:$0x3] %v98_v38  ;;  %110 = dma.vmem_to_hbm [thread:$0]  %s106_s1, 32, %s108_s26, [#allocation4]  }
  0x22   :  { %121 = dma.vmem_to_hbm [thread:$0]  %s117_s28, 32, %s119_s4, [#allocation9]  }
  0x23   :  { %241 = dma.done.wait [#allocation4], 32  }
  0x24   :  { %242 = vsyncadd [#allocation4], 4294967264 }
  0x25   :  { %243 = dma.done.wait [#allocation9], 32  }
  0x26   :  { %244 = vsyncadd [#allocation9], 4294967264 }
  0x27   :  { %130 = vsyncpa [#allocation3], 1 }
  0x28   :  { %131 = vsyncpa [#allocation6], 1 }
  0x29   :  { %132 = vsyncpa [#allocation4], 1 }
  0x2a   :  { %133 = vsyncpa [#allocation9], 1 }

</bundles_post_ra>
